<compile_context>
chip_gen: v6e
topology: v6e:2x2x1
jax: 0.10.0
libtpu: 0.0.40
codegen_flags: <defaults>
</compile_context>

<pallas_src>
import jax
import jax.numpy as jnp
from jax.experimental import pallas as pl
from jax.experimental.pallas import tpu as pltpu


def _roll_kernel(shift_ref, x_ref, o_ref):
    # shift_ref: SMEM scalar-prefetch ref, shape (1,), int32, value in [0, T)
    # x_ref / o_ref: (bt, T, tf) VMEM tiles; the same shift applies everywhere.
    # torch.roll(x, s, dims=1): out[:, t, :] = x[:, (t - s) mod T, :]
    # pltpu.roll == jnp.roll semantics; dynamic sublane rotate on the XLU.
    o_ref[...] = pltpu.roll(x_ref[...], shift_ref[0], axis=1)


def _pick_tiles(B, T, F, itemsize, target_bytes=4 << 20):
    """Choose (bt, tf): batch rows and feature lanes per block (~target_bytes)."""
    row_bytes = T * F * itemsize  # one batch row, full F
    if row_bytes <= target_bytes:
        # Whole feature axis per block; fold as many batch rows as fit.
        tf = F
        bt = max(1, min(B, target_bytes // max(row_bytes, 1)))
    else:
        # A single row exceeds the budget: tile F in lane-dense (x128) chunks.
        bt = 1
        if F <= 128:
            tf = F
        else:
            lanes = max(1, target_bytes // max(T * itemsize, 1))
            tf = max(128, (lanes // 128) * 128)  # multiple of 128 -> unmasked vst
            tf = min(tf, F)
    return int(bt), int(tf)


def random_time_roll(x, shift):
    """torch.roll(x, shift, dims=1) for x of shape (B, T, F); shift is an int32 scalar."""
    B, T, F = x.shape
    itemsize = jnp.dtype(x.dtype).itemsize
    # Normalize: torch.roll accepts any integer shift; the kernel expects [0, T).
    shift_arr = jnp.mod(jnp.asarray(shift, dtype=jnp.int32), jnp.int32(T)).reshape((1,))

    bt, tf = _pick_tiles(B, T, F, itemsize)
    grid = (pl.cdiv(B, bt), pl.cdiv(F, tf))

    block_bytes = bt * T * tf * itemsize
    # 1 input + 1 output, double-buffered = 4x block, plus slack; keep under
    # v7x's 64 MiB physical VMEM.
    vmem_limit = int(min(max(32 << 20, 4 * block_bytes + (4 << 20)), 64 << 20))

    return pl.pallas_call(
        _roll_kernel,
        out_shape=jax.ShapeDtypeStruct((B, T, F), x.dtype),
        grid_spec=pltpu.PrefetchScalarGridSpec(
            num_scalar_prefetch=1,
            grid=grid,
            in_specs=[
                pl.BlockSpec((bt, T, tf), lambda b, f, shift_ref: (b, 0, f)),
            ],
            out_specs=pl.BlockSpec((bt, T, tf), lambda b, f, shift_ref: (b, 0, f)),
        ),
        compiler_params=pltpu.CompilerParams(
            dimension_semantics=("parallel", "parallel"),
            vmem_limit_bytes=vmem_limit,
        ),
        cost_estimate=pl.CostEstimate(
            flops=0,
            transcendentals=0,
            bytes_accessed=2 * B * T * F * itemsize,
        ),
    )(shift_arr, x)


def random_time_roll_module(x, p, key):
    """Full module semantics: with probability p, roll by a uniform shift in [0, T)."""
    T = x.shape[1]
    k_apply, k_shift = jax.random.split(key)
    apply = jax.random.uniform(k_apply, ()) < p
    shift = jax.random.randint(k_shift, (), 0, T, dtype=jnp.int32)
    shift = jnp.where(apply, shift, jnp.int32(0))
    # Always run the kernel: shift == 0 is a plain copy and a lax.cond identity
    # branch would still materialize a copy of x anyway.
    return random_time_roll(x, shift), shift


if __name__ == "__main__":
    key = jax.random.PRNGKey(0)
    k_data, k_mod, k_data2 = jax.random.split(key, 3)

    B, T, F = 2, 16, 128
    x = jax.random.normal(k_data, (B, T, F), dtype=jnp.float32)

    # p = 1.0 forces the roll branch so the module path exercises the kernel.
    out, shift = random_time_roll_module(x, 1.0, k_mod)
    out = jax.block_until_ready(out)
    ref = jnp.roll(x, int(shift), axis=1)
    assert out.shape == x.shape and out.dtype == x.dtype
    assert jnp.allclose(out, ref), "mismatch vs jnp.roll reference"

    # Identity (no-roll) path through the kernel itself.
    out_id = jax.block_until_ready(random_time_roll(x, jnp.int32(0)))
    assert jnp.allclose(out_id, x), "identity path mismatch"

    # Out-of-range shift is normalized mod T (torch.roll semantics).
    out_big = jax.block_until_ready(random_time_roll(x, jnp.int32(T + 3)))
    assert jnp.allclose(out_big, jnp.roll(x, 3, axis=1)), "mod-T normalization mismatch"

    # Second shape (odd batch, wider F) through the same tiling logic.
    x2 = jax.random.normal(k_data2, (3, 16, 256), dtype=jnp.float32)
    out2 = jax.block_until_ready(random_time_roll(x2, jnp.int32(5)))
    assert jnp.allclose(out2, jnp.roll(x2, 5, axis=1)), "second-shape mismatch"

    print("KERNEL_OK")
</pallas_src>

<mosaic_0001>
module attributes {stable_mosaic.version = 11 : i64} {
  func.func @_roll_kernel(%arg0: i32, %arg1: i32, %arg2: memref<1xi32, #tpu.memory_space<smem>>, %arg3: memref<2x16x128xf32, #tpu.memory_space<vmem>>, %arg4: memref<2x16x128xf32, #tpu.memory_space<vmem>>) attributes {dimension_semantics = [#tpu.dimension_semantics<parallel>, #tpu.dimension_semantics<parallel>], iteration_bounds = array<i64: 1, 1>, scalar_prefetch = 1 : i64, scratch_operands = 0 : i64, tpu.core_type = #tpu.core_type<tc>, window_params = [{transform_indices = @transform_0, window_bounds = array<i64: 2, 16, 128>}, {transform_indices = @transform_1, window_bounds = array<i64: 2, 16, 128>}]} {
    %c0 = arith.constant 0 : index
    %c0_0 = arith.constant 0 : index
    %c0_1 = arith.constant 0 : index
    %0 = vector.load %arg3[%c0, %c0_0, %c0_1] : memref<2x16x128xf32, #tpu.memory_space<vmem>>, vector<2x16x128xf32>
    %c0_2 = arith.constant 0 : index
    %1 = memref.load %arg2[%c0_2] : memref<1xi32, #tpu.memory_space<smem>>
    %2 = tpu.dynamic_rotate %0 by %1 dim 1 : vector<2x16x128xf32>, i32 -> vector<2x16x128xf32>
    %c0_3 = arith.constant 0 : index
    %c0_4 = arith.constant 0 : index
    %c0_5 = arith.constant 0 : index
    %3 = vector.load %arg4[%c0_3, %c0_4, %c0_5] : memref<2x16x128xf32, #tpu.memory_space<vmem>>, vector<2x16x128xf32>
    tpu.vector_store %arg4[%c0_3, %c0_4, %c0_5], %2 {strides = array<i32>} : memref<2x16x128xf32, #tpu.memory_space<vmem>>, vector<2x16x128xf32>,
    return
  }
  func.func @transform_0(%arg0: i32, %arg1: i32, %arg2: memref<1xi32, #tpu.memory_space<smem>>) -> (i32, i32, i32) {
    %c0_i32 = arith.constant 0 : i32
    %c0_i32_0 = arith.constant 0 : i32
    return %arg0, %c0_i32, %arg1 : i32, i32, i32
  }
  func.func @transform_1(%arg0: i32, %arg1: i32, %arg2: memref<1xi32, #tpu.memory_space<smem>>) -> (i32, i32, i32) {
    %c0_i32 = arith.constant 0 : i32
    %c0_i32_0 = arith.constant 0 : i32
    return %arg0, %c0_i32, %arg1 : i32, i32, i32
  }
}

</mosaic_0001>

<bundles_post_ra>
// kernel: tpu_custom_call.1
= control target key start
LH: loop header
LB: loop body
LE: loop exit
PB: predicated region body
PF: predicated region fallthrough
CT: control target
= control target key end

     0   :  { %8 = vsyncpa [#allocation5], 0  ;;  %s164_s0 = inlined_call_operand.<no memory space> [shape: s32[1], index: 0, kind: input, shape index: {}]   ;;  %s165_s1 = inlined_call_operand.hbm [shape: f32[2,16,128], index: 1, kind: input, shape index: {}]   ;;  %s166_s2 = inlined_call_operand.hbm [shape: f32[2,16,128], index: 2, kind: output, shape index: {}]  }
   0x1   :  { %9 = vsyncpa [#allocation6], 0  ;;  %s126_s9 = smov [#allocation4]  }
   0x2   :  { %s15_s10 = sshll.u32 %s126_s9, 4  ;;  %s16_s10 = int_to_ptr.vmem [resolvable:$true] %s15_s10 }
   0x3   :  { %s90_s11 = scalar_lea.vmem %s16_s10, 512  ;;  %p95_p1 = scmp.lt.s32.totalorder %s16_s10, %s16_s10 }
   0x4   :  { %p91_p0 = scmp.ne.s32.totalorder %s16_s10, %s90_s11  ;;  %p96_p2 = scmp.lt.s32.totalorder %s90_s11, %s90_s11 }
   0x6   :  { %p97_p3 = por %p96_p2, %p95_p1 }
   0x8   :  { %p98_p4 = pnand %p97_p3, %p91_p0 }
   0xa   :  { %101 = shalt.err (!%p98_p4)
}
   0xb   :  { %s127_s12 = smov 128   ;;  %s128_s13 = smov 8  }
   0xc   :  { %21 = dma.hbm_to_vmem [thread:$0]  %s165_s1, 512, %s16_s10, [#allocation5], %s127_s12, %s127_s12, %s128_s13  }
   0xd   :  { %122 = dma.done.wait [#allocation5], 512  }
   0xe   :  { %123 = vsyncadd [#allocation5], 4294966784  ;;  %s30_s18 = sand.u32 15, %s164_s0   ;;  %v43_v0 = vlaneseq  ;;  %v25_v5 = vld [vmem:[#allocation4] sm:$0xff]  ;;  %v26_v6 = vld [vmem:[#allocation4 + $0x8] sm:$0xff]  ;;  %s129_s1 = smov [#allocation7]  }
   0xf   :  { %s31_s19 = sand.u32 7, %s30_s18   ;;  %s32_s20 = sshrl.u32 %s30_s18, 3  ;;  %v27_v7 = vld [vmem:[#allocation4 + $0x10] sm:$0xff]  ;;  %v28_v10 = vld [vmem:[#allocation4 + $0x18] sm:$0xff] }
  0x10   :  { %s33_s21 = ssub.s32 8, %s31_s19  ;;  %s50_s22 = sand.u32 1, %s32_s20  ;;  %v44_v1 = vshrl.u32 %v43_v0, 7  ;;  %v42_v2 = vstv %s31_s19 }
  0x11   :  { %v34_v3 = vstv %s33_s21  ;;  %v51_v4 = vstv %s50_s22  ;;  %s66_s0 = sshll.u32 %s129_s1, 4  ;;  %s67_s0 = int_to_ptr.vmem [resolvable:$true] %s66_s0 }
  0x12   :  { %vm45_vm0 = vcmp.lt.s32.totalorder %v44_v1, %v42_v2  ;;  %v35_v8 = vrot.slane %v25_v5, %v34_v3  ;;  %v39_v9 = vrot.slane %v26_v6, %v34_v3  ;;  %vm52_vm1 = vcmp.ne.s32.totalorder %v51_v4, 0  ;;  %s102_s23 = scalar_lea.vmem %s67_s0, 512  ;;  %p107_p6 = scmp.lt.s32.totalorder %s67_s0, %s67_s0 }
  0x13   :  { %v37_v11 = vrot.slane %v27_v7, %v34_v3  ;;  %v41_v12 = vrot.slane %v28_v10, %v34_v3  ;;  %p103_p5 = scmp.ne.s32.totalorder %s67_s0, %s102_s23  ;;  %p108_p7 = scmp.lt.s32.totalorder %s102_s23, %s102_s23 }
  0x14   :  { %v46_v13 = vsel %vm45_vm0, %v35_v8, %v39_v9  ;;  %v48_v14 = vsel %vm45_vm0, %v39_v9, %v35_v8 }
  0x15   :  { %v53_v15 = vsel %vm52_vm1, %v46_v13, %v48_v14  ;;  %v54_v16 = vsel %vm52_vm1, %v48_v14, %v46_v13  ;;  %v47_v17 = vsel %vm45_vm0, %v37_v11, %v41_v12  ;;  %v49_v18 = vsel %vm45_vm0, %v41_v12, %v37_v11  ;;  %p109_p8 = por %p108_p7, %p107_p6 }
  0x16   :  { %57 = vst [vmem:[#allocation7] sm:$0xff] %v53_v15  ;;  %58 = vst [vmem:[#allocation7 + $0x8] sm:$0xff] %v54_v16  ;;  %v55_v19 = vsel %vm52_vm1, %v47_v17, %v49_v18  ;;  %v56_v20 = vsel %vm52_vm1, %v49_v18, %v47_v17 }
  0x17   :  { %59 = vst [vmem:[#allocation7 + $0x10] sm:$0xff] %v55_v19  ;;  %60 = vst [vmem:[#allocation7 + $0x18] sm:$0xff] %v56_v20  ;;  %p110_p9 = pnand %p109_p8, %p103_p5 }
  0x19   :  { %113 = shalt.err (!%p110_p9)
}
  0x1a   :  { %72 = dma.vmem_to_hbm [thread:$0]  %s67_s0, 512, %s166_s2, [#allocation6], %s127_s12, %s127_s12, %s128_s13  }
  0x1b   :  { %124 = dma.done.wait [#allocation6], 512  }
  0x1c   :  { %125 = vsyncadd [#allocation6], 4294966784 }
  0x1d   :  { %76 = vsyncpa [#allocation5], 1 }
  0x1e   :  { %77 = vsyncpa [#allocation6], 1 }

</bundles_post_ra>
